<compile_context>
chip_gen: v5e
topology: v5e:2x2
jax: 0.10.0
libtpu: 0.0.40
codegen_flags: <defaults>
</compile_context>

<pallas_src>
import functools
import math

import jax
import jax.numpy as jnp
from jax.experimental import pallas as pl
from jax.experimental.pallas import tpu as pltpu


def _round_up(x, m):
    return ((x + m - 1) // m) * m


# ---------------------------------------------------------------------------
# Kernels
# ---------------------------------------------------------------------------

def _feature_matmul_kernel(x_ref, w_ref, s_ref):
    # s = x @ W1   (tiny, row-tiled, fully resident per tile)
    s_ref[...] = jnp.dot(
        x_ref[...], w_ref[...], preferred_element_type=jnp.float32
    ).astype(s_ref.dtype)


def _accumulate_adj(adj_ref, s_ref, acc_ref, *, tile_k):
    """acc += adj_tile @ s[k-tile]; returns predicate for the last k step."""
    k = pl.program_id(1)

    @pl.when(k == 0)
    def _():
        acc_ref[...] = jnp.zeros_like(acc_ref)

    start = pl.multiple_of(k * tile_k, tile_k)
    s_tile = s_ref[pl.ds(start, tile_k), :]          # resident s, sliced per k
    acc_ref[...] += jnp.dot(
        adj_ref[...], s_tile, preferred_element_type=jnp.float32
    )
    return k == pl.num_programs(1) - 1


def _layer1_kernel(adj_ref, s1_ref, w2_ref, s2_ref, acc_ref, *, tile_k):
    # s2[row tile] = relu(adj @ s1)[row tile] @ W2
    # (layer-2 feature matmul fused into the layer-1 finalize)
    done = _accumulate_adj(adj_ref, s1_ref, acc_ref, tile_k=tile_k)

    @pl.when(done)
    def _():
        h1 = jnp.maximum(acc_ref[...], 0.0).astype(w2_ref.dtype)
        s2_ref[...] = jnp.dot(
            h1, w2_ref[...], preferred_element_type=jnp.float32
        ).astype(s2_ref.dtype)


def _layer2_kernel(adj_ref, s2_ref, h2_ref, acc_ref, *, tile_k):
    # h2 = relu(adj @ s2)
    done = _accumulate_adj(adj_ref, s2_ref, acc_ref, tile_k=tile_k)

    @pl.when(done)
    def _():
        h2_ref[...] = jnp.maximum(acc_ref[...], 0.0).astype(h2_ref.dtype)


def _layer3_kernel(adj_ref, h2_ref, w3row_ref, out_ref, acc_ref, *, tile_k):
    # out = sigmoid(relu((adj @ h2) @ w3))  ==  sigmoid(relu(adj @ (h2 @ w3)))
    # The w3 contraction is a VPU/XLU lane reduction in the finalize, so no
    # zero-padded 128-wide MXU matmul or wide intermediate is needed.
    done = _accumulate_adj(adj_ref, h2_ref, acc_ref, tile_k=tile_k)

    @pl.when(done)
    def _():
        t = acc_ref[...]                                        # (tm, H) f32
        z = jnp.sum(t * w3row_ref[...], axis=-1, keepdims=True)  # (tm, 1)
        out_ref[...] = jax.nn.sigmoid(jnp.maximum(z, 0.0))


# ---------------------------------------------------------------------------
# pallas_call wrappers
# ---------------------------------------------------------------------------

def _run_feature(x_p, w, tile_m, out_dtype, vmem_limit):
    n_pad, f_in = x_p.shape
    f_out = w.shape[1]
    return pl.pallas_call(
        _feature_matmul_kernel,
        out_shape=jax.ShapeDtypeStruct((n_pad, f_out), out_dtype),
        grid_spec=pltpu.PrefetchScalarGridSpec(
            num_scalar_prefetch=0,
            grid=(n_pad // tile_m,),
            in_specs=[
                pl.BlockSpec((tile_m, f_in), lambda i: (i, 0)),
                pl.BlockSpec((f_in, f_out), lambda i: (0, 0)),
            ],
            out_specs=pl.BlockSpec((tile_m, f_out), lambda i: (i, 0)),
        ),
        compiler_params=pltpu.CompilerParams(
            dimension_semantics=("parallel",),
            vmem_limit_bytes=vmem_limit,
        ),
    )(x_p, w)


def _run_agg(kernel_fn, adj_p, s_resident, extras, out_cols, out_dtype,
             tile_m, tile_k, acc_cols, vmem_limit):
    n_pad = adj_p.shape[0]
    grid = (n_pad // tile_m, n_pad // tile_k)

    in_specs = [
        pl.BlockSpec((tile_m, tile_k), lambda i, k: (i, k)),   # adj: streamed
        pl.BlockSpec(s_resident.shape, lambda i, k: (0, 0)),   # s: resident
    ]
    operands = [adj_p, s_resident]
    for arr in extras:                                         # small weights
        in_specs.append(pl.BlockSpec(arr.shape, lambda i, k: (0, 0)))
        operands.append(arr)

    return pl.pallas_call(
        functools.partial(kernel_fn, tile_k=tile_k),
        out_shape=jax.ShapeDtypeStruct((n_pad, out_cols), out_dtype),
        grid_spec=pltpu.PrefetchScalarGridSpec(
            num_scalar_prefetch=0,
            grid=grid,
            in_specs=in_specs,
            out_specs=pl.BlockSpec((tile_m, out_cols), lambda i, k: (i, 0)),
            scratch_shapes=[pltpu.VMEM((tile_m, acc_cols), jnp.float32)],
        ),
        compiler_params=pltpu.CompilerParams(
            dimension_semantics=("parallel", "arbitrary"),
            vmem_limit_bytes=vmem_limit,
        ),
    )(*operands)


@functools.partial(jax.jit, static_argnames=("tile_m", "tile_k"))
def gcn_discriminator(x, adj, w1, w2, w3, *, tile_m=None, tile_k=None):
    """x: [N, hr_dim], adj: [N, N], w3: [hidden_dim, 1]. Returns [N, 1] f32."""
    n, _ = x.shape
    hidden = w1.shape[1]

    if tile_m is None or tile_k is None:
        n8 = _round_up(max(n, 8), 8)
        if n8 <= 1024:
            tile_m = tile_k = n8          # single-tile fast path for small graphs
        else:
            # Budgeted for v7x: 2 * 512*1024*2B adj double-buffer = 2 MiB,
            # well under the 32 MiB scoped / 64 MiB physical VMEM.
            tile_m, tile_k = 512, 1024

    n_pad = _round_up(n, math.lcm(tile_m, tile_k))
    compute_dtype = jnp.bfloat16
    vmem_limit = 32 * 1024 * 1024

    # One-time pad + bf16 cast of the streamed operands: adj is read 3x
    # (once per layer), so bf16 halves the dominant HBM traffic.
    adj_p = jnp.pad(adj, ((0, n_pad - n), (0, n_pad - n))).astype(compute_dtype)
    x_p = jnp.pad(x, ((0, n_pad - n), (0, 0))).astype(compute_dtype)
    w1_c = w1.astype(compute_dtype)
    w2_c = w2.astype(compute_dtype)
    w3_row = w3.reshape(1, hidden).astype(jnp.float32)

    # s1 = x @ W1 (kept resident for layer 1's adj reduction)
    s1 = _run_feature(x_p, w1_c, tile_m, compute_dtype, vmem_limit)

    # Layer 1 (+ fused layer-2 feature matmul): s2 = relu(adj @ s1) @ W2
    s2 = _run_agg(_layer1_kernel, adj_p, s1, [w2_c], hidden, compute_dtype,
                  tile_m, tile_k, hidden, vmem_limit)

    # Layer 2: h2 = relu(adj @ s2)
    h2 = _run_agg(_layer2_kernel, adj_p, s2, [], hidden, compute_dtype,
                  tile_m, tile_k, hidden, vmem_limit)

    # Layer 3: out = sigmoid(relu((adj @ h2) @ w3))
    out_p = _run_agg(_layer3_kernel, adj_p, h2, [w3_row], 1, jnp.float32,
                     tile_m, tile_k, hidden, vmem_limit)

    return out_p[:n, :]


# ---------------------------------------------------------------------------
# Self-test
# ---------------------------------------------------------------------------

if __name__ == "__main__":
    def glorot(k, shape):
        lim = (6.0 / (shape[0] + shape[1])) ** 0.5
        return jax.random.uniform(k, shape, jnp.float32, -lim, lim)

    def reference(x, adj, w1, w2, w3):
        h1 = jax.nn.relu(adj @ (x @ w1))
        h2 = jax.nn.relu(adj @ (h1 @ w2))
        h3 = jax.nn.relu(adj @ (h2 @ w3))
        return jax.nn.sigmoid(h3)

    key = jax.random.PRNGKey(0)
    N, HR_DIM, HIDDEN_DIM = 16, 32, 32
    kx, kadj, k1, k2, k3 = jax.random.split(key, 5)

    x = jax.random.normal(kx, (N, HR_DIM), dtype=jnp.float32)
    a = jax.random.uniform(kadj, (N, N), dtype=jnp.float32)
    a = (a + a.T) * 0.5 + jnp.eye(N, dtype=jnp.float32)
    adj = a / jnp.sum(a, axis=1, keepdims=True)

    w1 = glorot(k1, (HR_DIM, HIDDEN_DIM))
    w2 = glorot(k2, (HIDDEN_DIM, HIDDEN_DIM))
    w3 = glorot(k3, (HIDDEN_DIM, 1))

    # Case 1: tiny graph, default (single-tile) path.
    out = jax.block_until_ready(gcn_discriminator(x, adj, w1, w2, w3))
    ref = reference(x, adj, w1, w2, w3)
    assert out.shape == (N, 1), out.shape
    assert jnp.allclose(out, ref, atol=2e-2, rtol=2e-2), (
        "mismatch, max |diff| = %g" % float(jnp.max(jnp.abs(out - ref))))

    # Case 2: larger graph with explicit tiles to exercise the (row, k-reduce)
    # grid, accumulator init/finalize and the zero-padding path (N % tiles != 0).
    N2 = 200
    kx2, kadj2 = jax.random.split(jax.random.PRNGKey(1), 2)
    x2 = jax.random.normal(kx2, (N2, HR_DIM), dtype=jnp.float32)
    a2 = jax.random.uniform(kadj2, (N2, N2), dtype=jnp.float32)
    a2 = (a2 + a2.T) * 0.5 + jnp.eye(N2, dtype=jnp.float32)
    adj2 = a2 / jnp.sum(a2, axis=1, keepdims=True)

    out2 = jax.block_until_ready(
        gcn_discriminator(x2, adj2, w1, w2, w3, tile_m=64, tile_k=128))
    ref2 = reference(x2, adj2, w1, w2, w3)
    assert out2.shape == (N2, 1), out2.shape
    assert jnp.allclose(out2, ref2, atol=2e-2, rtol=2e-2), (
        "mismatch, max |diff| = %g" % float(jnp.max(jnp.abs(out2 - ref2))))

    print("KERNEL_OK")
</pallas_src>

<mosaic_0001>
module attributes {stable_mosaic.version = 11 : i64} {
  func.func @_feature_matmul_kernel(%arg0: i32, %arg1: memref<16x32xbf16, #tpu.memory_space<vmem>>, %arg2: memref<32x32xbf16, #tpu.memory_space<vmem>>, %arg3: memref<16x32xbf16, #tpu.memory_space<vmem>>) attributes {dimension_semantics = [#tpu.dimension_semantics<parallel>], iteration_bounds = array<i64: 1>, scalar_prefetch = 0 : i64, scratch_operands = 0 : i64, tpu.core_type = #tpu.core_type<tc>, window_params = [{transform_indices = @transform_0, window_bounds = array<i64: 16, 32>}, {pipeline_mode = #tpu.pipeline_mode<synchronous>, transform_indices = @transform_1, window_bounds = array<i64: 32, 32>}, {transform_indices = @transform_2, window_bounds = array<i64: 16, 32>}]} {
    %c0 = arith.constant 0 : index
    %c0_0 = arith.constant 0 : index
    %0 = vector.load %arg1[%c0, %c0_0] : memref<16x32xbf16, #tpu.memory_space<vmem>>, vector<16x32xbf16>
    %c0_1 = arith.constant 0 : index
    %c0_2 = arith.constant 0 : index
    %1 = vector.load %arg2[%c0_1, %c0_2] : memref<32x32xbf16, #tpu.memory_space<vmem>>, vector<32x32xbf16>
    %cst = arith.constant dense<0.000000e+00> : vector<16x32xf32>
    %2 = tpu.matmul %0, %1, %cst {dimension_numbers = #tpu.dot_dimension_numbers<[1], [0], [0], [1], [0, 0, 1, 1], [], []>} : vector<16x32xbf16>, vector<32x32xbf16>, vector<16x32xf32> -> vector<16x32xf32>
    %3 = arith.truncf %2 : vector<16x32xf32> to vector<16x32xbf16>
    %c0_3 = arith.constant 0 : index
    %c0_4 = arith.constant 0 : index
    %4 = vector.load %arg3[%c0_3, %c0_4] : memref<16x32xbf16, #tpu.memory_space<vmem>>, vector<16x32xbf16>
    tpu.vector_store %arg3[%c0_3, %c0_4], %3 {strides = array<i32>} : memref<16x32xbf16, #tpu.memory_space<vmem>>, vector<16x32xbf16>,
    return
  }
  func.func @transform_0(%arg0: i32) -> (i32, i32) {
    %c0_i32 = arith.constant 0 : i32
    %c0_i32_0 = arith.constant 0 : i32
    return %arg0, %c0_i32 : i32, i32
  }
  func.func @transform_1(%arg0: i32) -> (i32, i32) {
    %c0_i32 = arith.constant 0 : i32
    %c0_i32_0 = arith.constant 0 : i32
    %c0_i32_1 = arith.constant 0 : i32
    return %c0_i32, %c0_i32_0 : i32, i32
  }
  func.func @transform_2(%arg0: i32) -> (i32, i32) {
    %c0_i32 = arith.constant 0 : i32
    %c0_i32_0 = arith.constant 0 : i32
    return %arg0, %c0_i32 : i32, i32
  }
}

module attributes {stable_mosaic.version = 11 : i64} {
  func.func @_layer2_kernel(%arg0: i32, %arg1: i32, %arg2: memref<16x16xbf16, #tpu.memory_space<vmem>>, %arg3: memref<16x32xbf16, #tpu.memory_space<vmem>>, %arg4: memref<16x32xbf16, #tpu.memory_space<vmem>>, %arg5: memref<16x32xf32, #tpu.memory_space<vmem>>) attributes {dimension_semantics = [#tpu.dimension_semantics<parallel>, #tpu.dimension_semantics<arbitrary>], iteration_bounds = array<i64: 1, 1>, scalar_prefetch = 0 : i64, scratch_operands = 1 : i64, tpu.core_type = #tpu.core_type<tc>, window_params = [{transform_indices = @transform_0, window_bounds = array<i64: 16, 16>}, {pipeline_mode = #tpu.pipeline_mode<synchronous>, transform_indices = @transform_1, window_bounds = array<i64: 16, 32>}, {transform_indices = @transform_2, window_bounds = array<i64: 16, 32>}]} {
    %c0_i32 = arith.constant 0 : i32
    %0 = arith.cmpi eq, %arg1, %c0_i32 : i32
    %1 = arith.extui %0 : i1 to i32
    %c0_i32_0 = arith.constant 0 : i32
    %2 = arith.cmpi ne, %1, %c0_i32_0 : i32
    scf.if %2 {
      %cst_9 = arith.constant 0.000000e+00 : f32
      %15 = vector.broadcast %cst_9 : f32 to vector<16x32xf32>
      %c0_10 = arith.constant 0 : index
      %c0_11 = arith.constant 0 : index
      %16 = vector.load %arg5[%c0_10, %c0_11] : memref<16x32xf32, #tpu.memory_space<vmem>>, vector<16x32xf32>
      tpu.vector_store %arg5[%c0_10, %c0_11], %15 {strides = array<i32>} : memref<16x32xf32, #tpu.memory_space<vmem>>, vector<16x32xf32>,
    } else {
    }
    %c16_i32 = arith.constant 16 : i32
    %3 = arith.muli %arg1, %c16_i32 : i32
    %4 = tpu.assume_multiple %3, 16 : i32
    %5 = arith.index_cast %4 : i32 to index
    %c0 = arith.constant 0 : index
    %6 = vector.load %arg3[%5, %c0] : memref<16x32xbf16, #tpu.memory_space<vmem>>, vector<16x32xbf16>
    %c0_1 = arith.constant 0 : index
    %c0_2 = arith.constant 0 : index
    %7 = vector.load %arg5[%c0_1, %c0_2] : memref<16x32xf32, #tpu.memory_space<vmem>>, vector<16x32xf32>
    %c0_3 = arith.constant 0 : index
    %c0_4 = arith.constant 0 : index
    %8 = vector.load %arg2[%c0_3, %c0_4] : memref<16x16xbf16, #tpu.memory_space<vmem>>, vector<16x16xbf16>
    %cst = arith.constant dense<0.000000e+00> : vector<16x32xf32>
    %9 = tpu.matmul %8, %6, %cst {dimension_numbers = #tpu.dot_dimension_numbers<[1], [0], [0], [1], [0, 0, 1, 1], [], []>} : vector<16x16xbf16>, vector<16x32xbf16>, vector<16x32xf32> -> vector<16x32xf32>
    %10 = arith.addf %7, %9 : vector<16x32xf32>
    %c0_5 = arith.constant 0 : index
    %c0_6 = arith.constant 0 : index
    %11 = vector.load %arg5[%c0_5, %c0_6] : memref<16x32xf32, #tpu.memory_space<vmem>>, vector<16x32xf32>
    tpu.vector_store %arg5[%c0_5, %c0_6], %10 {strides = array<i32>} : memref<16x32xf32, #tpu.memory_space<vmem>>, vector<16x32xf32>,
    %c0_i32_7 = arith.constant 0 : i32
    %12 = arith.cmpi eq, %arg1, %c0_i32_7 : i32
    %13 = arith.extui %12 : i1 to i32
    %c0_i32_8 = arith.constant 0 : i32
    %14 = arith.cmpi ne, %13, %c0_i32_8 : i32
    scf.if %14 {
      %c0_9 = arith.constant 0 : index
      %c0_10 = arith.constant 0 : index
      %15 = vector.load %arg5[%c0_9, %c0_10] : memref<16x32xf32, #tpu.memory_space<vmem>>, vector<16x32xf32>
      %cst_11 = arith.constant 0.000000e+00 : f32
      %16 = vector.broadcast %cst_11 : f32 to vector<16x32xf32>
      %17 = arith.maximumf %15, %16 : vector<16x32xf32>
      %18 = arith.truncf %17 : vector<16x32xf32> to vector<16x32xbf16>
      %c0_12 = arith.constant 0 : index
      %c0_13 = arith.constant 0 : index
      %19 = vector.load %arg4[%c0_12, %c0_13] : memref<16x32xbf16, #tpu.memory_space<vmem>>, vector<16x32xbf16>
      tpu.vector_store %arg4[%c0_12, %c0_13], %18 {strides = array<i32>} : memref<16x32xbf16, #tpu.memory_space<vmem>>, vector<16x32xbf16>,
    } else {
    }
    return
  }
  func.func @transform_0(%arg0: i32, %arg1: i32) -> (i32, i32) {
    %c0_i32 = arith.constant 0 : i32
    return %arg0, %arg1 : i32, i32
  }
  func.func @transform_1(%arg0: i32, %arg1: i32) -> (i32, i32) {
    %c0_i32 = arith.constant 0 : i32
    %c0_i32_0 = arith.constant 0 : i32
    %c0_i32_1 = arith.constant 0 : i32
    return %c0_i32, %c0_i32_0 : i32, i32
  }
  func.func @transform_2(%arg0: i32, %arg1: i32) -> (i32, i32) {
    %c0_i32 = arith.constant 0 : i32
    %c0_i32_0 = arith.constant 0 : i32
    return %arg0, %c0_i32 : i32, i32
  }
}

module attributes {stable_mosaic.version = 11 : i64} {
  func.func @_layer3_kernel(%arg0: i32, %arg1: i32, %arg2: memref<16x16xbf16, #tpu.memory_space<vmem>>, %arg3: memref<16x32xbf16, #tpu.memory_space<vmem>>, %arg4: memref<1x32xf32, #tpu.memory_space<vmem>>, %arg5: memref<16x1xf32, #tpu.memory_space<vmem>>, %arg6: memref<16x32xf32, #tpu.memory_space<vmem>>) attributes {dimension_semantics = [#tpu.dimension_semantics<parallel>, #tpu.dimension_semantics<arbitrary>], iteration_bounds = array<i64: 1, 1>, scalar_prefetch = 0 : i64, scratch_operands = 1 : i64, tpu.core_type = #tpu.core_type<tc>, window_params = [{transform_indices = @transform_0, window_bounds = array<i64: 16, 16>}, {pipeline_mode = #tpu.pipeline_mode<synchronous>, transform_indices = @transform_1, window_bounds = array<i64: 16, 32>}, {pipeline_mode = #tpu.pipeline_mode<synchronous>, transform_indices = @transform_2, window_bounds = array<i64: 1, 32>}, {transform_indices = @transform_3, window_bounds = array<i64: 16, 1>}]} {
    %c0_i32 = arith.constant 0 : i32
    %0 = arith.cmpi eq, %arg1, %c0_i32 : i32
    %1 = arith.extui %0 : i1 to i32
    %c0_i32_0 = arith.constant 0 : i32
    %2 = arith.cmpi ne, %1, %c0_i32_0 : i32
    scf.if %2 {
      %cst_9 = arith.constant 0.000000e+00 : f32
      %15 = vector.broadcast %cst_9 : f32 to vector<16x32xf32>
      %c0_10 = arith.constant 0 : index
      %c0_11 = arith.constant 0 : index
      %16 = vector.load %arg6[%c0_10, %c0_11] : memref<16x32xf32, #tpu.memory_space<vmem>>, vector<16x32xf32>
      tpu.vector_store %arg6[%c0_10, %c0_11], %15 {strides = array<i32>} : memref<16x32xf32, #tpu.memory_space<vmem>>, vector<16x32xf32>,
    } else {
    }
    %c16_i32 = arith.constant 16 : i32
    %3 = arith.muli %arg1, %c16_i32 : i32
    %4 = tpu.assume_multiple %3, 16 : i32
    %5 = arith.index_cast %4 : i32 to index
    %c0 = arith.constant 0 : index
    %6 = vector.load %arg3[%5, %c0] : memref<16x32xbf16, #tpu.memory_space<vmem>>, vector<16x32xbf16>
    %c0_1 = arith.constant 0 : index
    %c0_2 = arith.constant 0 : index
    %7 = vector.load %arg6[%c0_1, %c0_2] : memref<16x32xf32, #tpu.memory_space<vmem>>, vector<16x32xf32>
    %c0_3 = arith.constant 0 : index
    %c0_4 = arith.constant 0 : index
    %8 = vector.load %arg2[%c0_3, %c0_4] : memref<16x16xbf16, #tpu.memory_space<vmem>>, vector<16x16xbf16>
    %cst = arith.constant dense<0.000000e+00> : vector<16x32xf32>
    %9 = tpu.matmul %8, %6, %cst {dimension_numbers = #tpu.dot_dimension_numbers<[1], [0], [0], [1], [0, 0, 1, 1], [], []>} : vector<16x16xbf16>, vector<16x32xbf16>, vector<16x32xf32> -> vector<16x32xf32>
    %10 = arith.addf %7, %9 : vector<16x32xf32>
    %c0_5 = arith.constant 0 : index
    %c0_6 = arith.constant 0 : index
    %11 = vector.load %arg6[%c0_5, %c0_6] : memref<16x32xf32, #tpu.memory_space<vmem>>, vector<16x32xf32>
    tpu.vector_store %arg6[%c0_5, %c0_6], %10 {strides = array<i32>} : memref<16x32xf32, #tpu.memory_space<vmem>>, vector<16x32xf32>,
    %c0_i32_7 = arith.constant 0 : i32
    %12 = arith.cmpi eq, %arg1, %c0_i32_7 : i32
    %13 = arith.extui %12 : i1 to i32
    %c0_i32_8 = arith.constant 0 : i32
    %14 = arith.cmpi ne, %13, %c0_i32_8 : i32
    scf.if %14 {
      %c0_9 = arith.constant 0 : index
      %c0_10 = arith.constant 0 : index
      %15 = vector.load %arg6[%c0_9, %c0_10] : memref<16x32xf32, #tpu.memory_space<vmem>>, vector<16x32xf32>
      %c0_11 = arith.constant 0 : index
      %c0_12 = arith.constant 0 : index
      %16 = vector.load %arg4[%c0_11, %c0_12] : memref<1x32xf32, #tpu.memory_space<vmem>>, vector<1x32xf32>
      %17 = vector.broadcast %16 : vector<1x32xf32> to vector<16x32xf32>
      %18 = arith.mulf %15, %17 : vector<16x32xf32>
      %cst_13 = arith.constant dense<0.000000e+00> : vector<16xf32>
      %19 = vector.multi_reduction <add>, %18, %cst_13 [1] : vector<16x32xf32> to vector<16xf32>
      %20 = vector.shape_cast %19 : vector<16xf32> to vector<16x1xf32>
      %cst_14 = arith.constant 0.000000e+00 : f32
      %21 = vector.broadcast %cst_14 : f32 to vector<16x1xf32>
      %22 = arith.maximumf %20, %21 : vector<16x1xf32>
      %23 = arith.negf %22 : vector<16x1xf32>
      %24 = math.exp %23 : vector<16x1xf32>
      %cst_15 = arith.constant 1.000000e+00 : f32
      %25 = vector.broadcast %cst_15 : f32 to vector<16x1xf32>
      %26 = arith.addf %25, %24 : vector<16x1xf32>
      %27 = arith.divf %25, %26 : vector<16x1xf32>
      %c0_16 = arith.constant 0 : index
      %c0_17 = arith.constant 0 : index
      %28 = vector.load %arg5[%c0_16, %c0_17] : memref<16x1xf32, #tpu.memory_space<vmem>>, vector<16x1xf32>
      tpu.vector_store %arg5[%c0_16, %c0_17], %27 {strides = array<i32>} : memref<16x1xf32, #tpu.memory_space<vmem>>, vector<16x1xf32>,
    } else {
    }
    return
  }
  func.func @transform_0(%arg0: i32, %arg1: i32) -> (i32, i32) {
    %c0_i32 = arith.constant 0 : i32
    return %arg0, %arg1 : i32, i32
  }
  func.func @transform_1(%arg0: i32, %arg1: i32) -> (i32, i32) {
    %c0_i32 = arith.constant 0 : i32
    %c0_i32_0 = arith.constant 0 : i32
    %c0_i32_1 = arith.constant 0 : i32
    return %c0_i32, %c0_i32_0 : i32, i32
  }
  func.func @transform_2(%arg0: i32, %arg1: i32) -> (i32, i32) {
    %c0_i32 = arith.constant 0 : i32
    %c0_i32_0 = arith.constant 0 : i32
    %c0_i32_1 = arith.constant 0 : i32
    return %c0_i32, %c0_i32_0 : i32, i32
  }
  func.func @transform_3(%arg0: i32, %arg1: i32) -> (i32, i32) {
    %c0_i32 = arith.constant 0 : i32
    %c0_i32_0 = arith.constant 0 : i32
    return %arg0, %c0_i32 : i32, i32
  }
}

module attributes {stable_mosaic.version = 11 : i64} {
  func.func @_layer1_kernel(%arg0: i32, %arg1: i32, %arg2: memref<16x16xbf16, #tpu.memory_space<vmem>>, %arg3: memref<16x32xbf16, #tpu.memory_space<vmem>>, %arg4: memref<32x32xbf16, #tpu.memory_space<vmem>>, %arg5: memref<16x32xbf16, #tpu.memory_space<vmem>>, %arg6: memref<16x32xf32, #tpu.memory_space<vmem>>) attributes {dimension_semantics = [#tpu.dimension_semantics<parallel>, #tpu.dimension_semantics<arbitrary>], iteration_bounds = array<i64: 1, 1>, scalar_prefetch = 0 : i64, scratch_operands = 1 : i64, tpu.core_type = #tpu.core_type<tc>, window_params = [{transform_indices = @transform_0, window_bounds = array<i64: 16, 16>}, {pipeline_mode = #tpu.pipeline_mode<synchronous>, transform_indices = @transform_1, window_bounds = array<i64: 16, 32>}, {pipeline_mode = #tpu.pipeline_mode<synchronous>, transform_indices = @transform_2, window_bounds = array<i64: 32, 32>}, {transform_indices = @transform_3, window_bounds = array<i64: 16, 32>}]} {
    %c0_i32 = arith.constant 0 : i32
    %0 = arith.cmpi eq, %arg1, %c0_i32 : i32
    %1 = arith.extui %0 : i1 to i32
    %c0_i32_0 = arith.constant 0 : i32
    %2 = arith.cmpi ne, %1, %c0_i32_0 : i32
    scf.if %2 {
      %cst_9 = arith.constant 0.000000e+00 : f32
      %15 = vector.broadcast %cst_9 : f32 to vector<16x32xf32>
      %c0_10 = arith.constant 0 : index
      %c0_11 = arith.constant 0 : index
      %16 = vector.load %arg6[%c0_10, %c0_11] : memref<16x32xf32, #tpu.memory_space<vmem>>, vector<16x32xf32>
      tpu.vector_store %arg6[%c0_10, %c0_11], %15 {strides = array<i32>} : memref<16x32xf32, #tpu.memory_space<vmem>>, vector<16x32xf32>,
    } else {
    }
    %c16_i32 = arith.constant 16 : i32
    %3 = arith.muli %arg1, %c16_i32 : i32
    %4 = tpu.assume_multiple %3, 16 : i32
    %5 = arith.index_cast %4 : i32 to index
    %c0 = arith.constant 0 : index
    %6 = vector.load %arg3[%5, %c0] : memref<16x32xbf16, #tpu.memory_space<vmem>>, vector<16x32xbf16>
    %c0_1 = arith.constant 0 : index
    %c0_2 = arith.constant 0 : index
    %7 = vector.load %arg6[%c0_1, %c0_2] : memref<16x32xf32, #tpu.memory_space<vmem>>, vector<16x32xf32>
    %c0_3 = arith.constant 0 : index
    %c0_4 = arith.constant 0 : index
    %8 = vector.load %arg2[%c0_3, %c0_4] : memref<16x16xbf16, #tpu.memory_space<vmem>>, vector<16x16xbf16>
    %cst = arith.constant dense<0.000000e+00> : vector<16x32xf32>
    %9 = tpu.matmul %8, %6, %cst {dimension_numbers = #tpu.dot_dimension_numbers<[1], [0], [0], [1], [0, 0, 1, 1], [], []>} : vector<16x16xbf16>, vector<16x32xbf16>, vector<16x32xf32> -> vector<16x32xf32>
    %10 = arith.addf %7, %9 : vector<16x32xf32>
    %c0_5 = arith.constant 0 : index
    %c0_6 = arith.constant 0 : index
    %11 = vector.load %arg6[%c0_5, %c0_6] : memref<16x32xf32, #tpu.memory_space<vmem>>, vector<16x32xf32>
    tpu.vector_store %arg6[%c0_5, %c0_6], %10 {strides = array<i32>} : memref<16x32xf32, #tpu.memory_space<vmem>>, vector<16x32xf32>,
    %c0_i32_7 = arith.constant 0 : i32
    %12 = arith.cmpi eq, %arg1, %c0_i32_7 : i32
    %13 = arith.extui %12 : i1 to i32
    %c0_i32_8 = arith.constant 0 : i32
    %14 = arith.cmpi ne, %13, %c0_i32_8 : i32
    scf.if %14 {
      %c0_9 = arith.constant 0 : index
      %c0_10 = arith.constant 0 : index
      %15 = vector.load %arg6[%c0_9, %c0_10] : memref<16x32xf32, #tpu.memory_space<vmem>>, vector<16x32xf32>
      %cst_11 = arith.constant 0.000000e+00 : f32
      %16 = vector.broadcast %cst_11 : f32 to vector<16x32xf32>
      %17 = arith.maximumf %15, %16 : vector<16x32xf32>
      %18 = arith.truncf %17 : vector<16x32xf32> to vector<16x32xbf16>
      %c0_12 = arith.constant 0 : index
      %c0_13 = arith.constant 0 : index
      %19 = vector.load %arg4[%c0_12, %c0_13] : memref<32x32xbf16, #tpu.memory_space<vmem>>, vector<32x32xbf16>
      %cst_14 = arith.constant dense<0.000000e+00> : vector<16x32xf32>
      %20 = tpu.matmul %18, %19, %cst_14 {dimension_numbers = #tpu.dot_dimension_numbers<[1], [0], [0], [1], [0, 0, 1, 1], [], []>} : vector<16x32xbf16>, vector<32x32xbf16>, vector<16x32xf32> -> vector<16x32xf32>
      %21 = arith.truncf %20 : vector<16x32xf32> to vector<16x32xbf16>
      %c0_15 = arith.constant 0 : index
      %c0_16 = arith.constant 0 : index
      %22 = vector.load %arg5[%c0_15, %c0_16] : memref<16x32xbf16, #tpu.memory_space<vmem>>, vector<16x32xbf16>
      tpu.vector_store %arg5[%c0_15, %c0_16], %21 {strides = array<i32>} : memref<16x32xbf16, #tpu.memory_space<vmem>>, vector<16x32xbf16>,
    } else {
    }
    return
  }
  func.func @transform_0(%arg0: i32, %arg1: i32) -> (i32, i32) {
    %c0_i32 = arith.constant 0 : i32
    return %arg0, %arg1 : i32, i32
  }
  func.func @transform_1(%arg0: i32, %arg1: i32) -> (i32, i32) {
    %c0_i32 = arith.constant 0 : i32
    %c0_i32_0 = arith.constant 0 : i32
    %c0_i32_1 = arith.constant 0 : i32
    return %c0_i32, %c0_i32_0 : i32, i32
  }
  func.func @transform_2(%arg0: i32, %arg1: i32) -> (i32, i32) {
    %c0_i32 = arith.constant 0 : i32
    %c0_i32_0 = arith.constant 0 : i32
    %c0_i32_1 = arith.constant 0 : i32
    return %c0_i32, %c0_i32_0 : i32, i32
  }
  func.func @transform_3(%arg0: i32, %arg1: i32) -> (i32, i32) {
    %c0_i32 = arith.constant 0 : i32
    %c0_i32_0 = arith.constant 0 : i32
    return %arg0, %c0_i32 : i32, i32
  }
}

</mosaic_0001>

<bundles_post_ra>
// kernel: gcn_discriminator.4
= control target key start
LH: loop header
LB: loop body
LE: loop exit
PB: predicated region body
PF: predicated region fallthrough
CT: control target
= control target key end

     0   :  { %vm35_vm0 = vcmask 261120   ;;  %vm55_vm1 = vcmask 257024   ;;  %s108_s1 = inlined_call_operand.vmem [shape: bf16[32,32], index: 1, kind: input, shape index: {}]   ;;  %s109_s0 = inlined_call_operand.vmem [shape: bf16[16,32], index: 0, kind: input, shape index: {}]   ;;  %s110_s2 = inlined_call_operand.vmem [shape: bf16[16,32], index: 2, kind: output, shape index: {}]  }
   0x1   :  { %v77_v0 = vld [vmem:[%s108_s1 + $0x8] sm:$0xff]  ;;  %v76_v1 = vld [vmem:[%s108_s1] sm:$0xff] }
   0x2   :  { %45 = vmatpush.bf16.msra.mxu0 %v77_v0  ;;  %v75_v2 = vld [vmem:[%s109_s0] sm:$0xff] }
   0x6   :  { %46 = vmatpush.bf16.msra.mxu0 %v76_v1 }
   0x9   :  { %74 = vmatmul.msk.bf16.vlgmr.msra.gmra.mxu0 %vm35_vm0, %v75_v2 }
  0x86   :  { %v48_v3 = vpop.f32.mrf.mxu0 }
  0x87   :  { %v53_v4 = vpack.c.bf16 %v48_v3, %v48_v3 }
  0x89   :  { %56 = vst.msk [vmem:[%s110_s2] sm:$0xf] %vm55_vm1, %v53_v4 }
  0x8e   :  { %v50_v5 = vpop.f32.mrf.mxu0 }
  0x8f   :  { %v54_v6 = vpack.c.bf16 %v50_v5, %v50_v5 }
  0x91   :  { %57 = vst.msk [vmem:[%s110_s2 + $0x4] sm:$0xf] %vm55_vm1, %v54_v6 }

// kernel: gcn_discriminator.5
= control target key start
LH: loop header
LB: loop body
LE: loop exit
PB: predicated region body
PF: predicated region fallthrough
CT: control target
= control target key end

     0   :  { %vm19_vm0 = vcmask 261120   ;;  %v142_v1 = vmov 0.0   ;;  %vm44_vm1 = vcmask 130048   ;;  %vm110_vm2 = vcmask 257024   ;;  %s186_s1 = inlined_call_operand.vmem [shape: bf16[16,32], index: 1, kind: input, shape index: {}]   ;;  %s187_s0 = inlined_call_operand.vmem [shape: bf16[16,16], index: 0, kind: input, shape index: {}]   ;;  %s188_s2 = inlined_call_operand.vmem [shape: bf16[32,32], index: 2, kind: input, shape index: {}]   ;;  %s189_s3 = inlined_call_operand.vmem [shape: bf16[16,32], index: 3, kind: output, shape index: {}]  }
   0x1   :  { %v137_v0 = vld [vmem:[%s186_s1] sm:$0xff]  ;;  %20 = vst.msk [vmem:[#allocation2] sm:$0xff] %vm19_vm0, %v142_v1  ;;  %v140_v3 = vld [vmem:[%s188_s2 + $0x8] sm:$0xff] }
   0x2   :  { %v138_v2 = vld [vmem:[%s187_s0] sm:$0xff]  ;;  %21 = vst.msk [vmem:[#allocation2 + $0x8] sm:$0xff] %vm19_vm0, %v142_v1  ;;  %55 = vmatpush.bf16.msra.mxu0 %v137_v0  ;;  %100 = vmatpush.bf16.msra.mxu1 %v140_v3 }
   0x3   :  { %v139_v4 = vld [vmem:[%s188_s2] sm:$0xff] }
   0x5   :  { %127 = vmatmul.msk.bf16.vlgmr.msra.gmra.mxu0 %vm44_vm1, %v138_v2 }
   0x6   :  { %101 = vmatpush.bf16.msra.mxu1 %v139_v4 }
   0x8   :  { %v29_v5 = vld [vmem:[#allocation2] sm:$0xff] }
   0x9   :  { %v30_v8 = vld [vmem:[#allocation2 + $0x8] sm:$0xff] }
  0x82   :  { %v57_v6 = vpop.f32.mrf.mxu0 }
  0x83   :  { %v62_v7 = vadd.f32 %v57_v6, %v29_v5 }
  0x85   :  { %65 = vst.msk [vmem:[#allocation2] sm:$0xff] %vm19_vm0, %v62_v7 }
  0x8a   :  { %v59_v9 = vpop.f32.mrf.mxu0 }
  0x8b   :  { %v63_v10 = vadd.f32 %v59_v9, %v30_v8 }
  0x8c   :  { %v70_v11 = vld [vmem:[#allocation2] sm:$0xff] }
  0x8d   :  { %66 = vst.msk [vmem:[#allocation2 + $0x8] sm:$0xff] %vm19_vm0, %v63_v10  ;;  %v72_v13 = vmax.f32 %v70_v11, 0.0 }
  0x94   :  { %v71_v12 = vld [vmem:[#allocation2 + $0x8] sm:$0xff] }
  0x95   :  { %v73_v14 = vmax.f32 %v71_v12, 0.0 }
  0x97   :  { %v74_v15 = vpack.c.bf16 %v73_v14, %v72_v13 }
  0x99   :  { %136 = vmatmul.msk.bf16.vlgmr.msra.gmra.mxu1 %vm19_vm0, %v74_v15 }
 0x116   :  { %v103_v16 = vpop.f32.mrf.mxu1 }
 0x117   :  { %v108_v17 = vpack.c.bf16 %v103_v16, %v103_v16 }
 0x119   :  { %111 = vst.msk [vmem:[%s189_s3] sm:$0xf] %vm110_vm2, %v108_v17 }
 0x11e   :  { %v105_v18 = vpop.f32.mrf.mxu1 }
 0x11f   :  { %v109_v19 = vpack.c.bf16 %v105_v18, %v105_v18 }
 0x121   :  { %112 = vst.msk [vmem:[%s189_s3 + $0x4] sm:$0xf] %vm110_vm2, %v109_v19 }

// kernel: gcn_discriminator.6
= control target key start
LH: loop header
LB: loop body
LE: loop exit
PB: predicated region body
PF: predicated region fallthrough
CT: control target
= control target key end

     0   :  { %vm16_vm0 = vcmask 261120   ;;  %v94_v1 = vmov 0.0   ;;  %vm41_vm1 = vcmask 130048   ;;  %vm73_vm2 = vcmask 257024   ;;  %s126_s1 = inlined_call_operand.vmem [shape: bf16[16,32], index: 1, kind: input, shape index: {}]   ;;  %s127_s0 = inlined_call_operand.vmem [shape: bf16[16,16], index: 0, kind: input, shape index: {}]   ;;  %s128_s2 = inlined_call_operand.vmem [shape: bf16[16,32], index: 2, kind: output, shape index: {}]  }
   0x1   :  { %v91_v0 = vld [vmem:[%s126_s1] sm:$0xff]  ;;  %17 = vst.msk [vmem:[#allocation2] sm:$0xff] %vm16_vm0, %v94_v1 }
   0x2   :  { %v92_v2 = vld [vmem:[%s127_s0] sm:$0xff]  ;;  %18 = vst.msk [vmem:[#allocation2 + $0x8] sm:$0xff] %vm16_vm0, %v94_v1  ;;  %52 = vmatpush.bf16.msra.mxu0 %v91_v0 }
   0x5   :  { %90 = vmatmul.msk.bf16.vlgmr.msra.gmra.mxu0 %vm41_vm1, %v92_v2 }
   0x8   :  { %v26_v3 = vld [vmem:[#allocation2] sm:$0xff] }
   0x9   :  { %v27_v6 = vld [vmem:[#allocation2 + $0x8] sm:$0xff] }
  0x82   :  { %v54_v4 = vpop.f32.mrf.mxu0 }
  0x83   :  { %v59_v5 = vadd.f32 %v54_v4, %v26_v3 }
  0x85   :  { %62 = vst.msk [vmem:[#allocation2] sm:$0xff] %vm16_vm0, %v59_v5 }
  0x8a   :  { %v56_v7 = vpop.f32.mrf.mxu0 }
  0x8b   :  { %v60_v8 = vadd.f32 %v56_v7, %v27_v6 }
  0x8c   :  { %v67_v9 = vld [vmem:[#allocation2] sm:$0xff] }
  0x8d   :  { %v69_v10 = vmax.f32 %v67_v9, 0.0  ;;  %63 = vst.msk [vmem:[#allocation2 + $0x8] sm:$0xff] %vm16_vm0, %v60_v8 }
  0x8f   :  { %v71_v11 = vpack.c.bf16 %v69_v10, %v69_v10 }
  0x91   :  { %74 = vst.msk [vmem:[%s128_s2] sm:$0xf] %vm73_vm2, %v71_v11 }
  0x94   :  { %v68_v12 = vld [vmem:[#allocation2 + $0x8] sm:$0xff] }
  0x95   :  { %v70_v13 = vmax.f32 %v68_v12, 0.0 }
  0x97   :  { %v72_v14 = vpack.c.bf16 %v70_v13, %v70_v13 }
  0x99   :  { %75 = vst.msk [vmem:[%s128_s2 + $0x4] sm:$0xf] %vm73_vm2, %v72_v14 }

// kernel: gcn_discriminator.7
= control target key start
LH: loop header
LB: loop body
LE: loop exit
PB: predicated region body
PF: predicated region fallthrough
CT: control target
= control target key end

     0   :  { %vm19_vm0 = vcmask 261120   ;;  %v156_v1 = vmov 0.0   ;;  %vm44_vm1 = vcmask 130048   ;;  %vm124_vm4 = vcmask 7168   ;;  %s200_s1 = inlined_call_operand.vmem [shape: bf16[16,32], index: 1, kind: input, shape index: {}]   ;;  %s201_s0 = inlined_call_operand.vmem [shape: bf16[16,16], index: 0, kind: input, shape index: {}]   ;;  %s202_s2 = inlined_call_operand.vmem [shape: f32[1,32], index: 2, kind: input, shape index: {}]   ;;  %s203_s3 = inlined_call_operand.vmem [shape: f32[16,1], index: 3, kind: output, shape index: {}]  }
   0x1   :  { %v144_v0 = vld [vmem:[%s200_s1] sm:$0xff]  ;;  %20 = vst.msk [vmem:[#allocation2] sm:$0xff] %vm19_vm0, %v156_v1 }
   0x2   :  { %v145_v2 = vld [vmem:[%s201_s0] sm:$0xff]  ;;  %21 = vst.msk [vmem:[#allocation2 + $0x8] sm:$0xff] %vm19_vm0, %v156_v1  ;;  %55 = vmatpush.bf16.msra.mxu0 %v144_v0 }
   0x3   :  { %v147_v7 = vld [vmem:[%s202_s2] ss:$0 sm:$0xff] }
   0x5   :  { %141 = vmatmul.msk.bf16.vlgmr.msra.gmra.mxu0 %vm44_vm1, %v145_v2 }
   0x8   :  { %v29_v3 = vld [vmem:[#allocation2] sm:$0xff] }
   0x9   :  { %v30_v6 = vld [vmem:[#allocation2 + $0x8] sm:$0xff] }
  0x82   :  { %v57_v4 = vpop.f32.mrf.mxu0 }
  0x83   :  { %v62_v5 = vadd.f32 %v57_v4, %v29_v3 }
  0x85   :  { %65 = vst.msk [vmem:[#allocation2] sm:$0xff] %vm19_vm0, %v62_v5 }
  0x8a   :  { %v59_v8 = vpop.f32.mrf.mxu0 }
  0x8b   :  { %v63_v9 = vadd.f32 %v59_v8, %v30_v6 }
  0x8c   :  { %v70_v10 = vld [vmem:[#allocation2] sm:$0xff] }
  0x8d   :  { %66 = vst.msk [vmem:[#allocation2 + $0x8] sm:$0xff] %vm19_vm0, %v63_v9  ;;  %v76_v11 = vmul.f32 %v147_v7, %v70_v10 }
  0x8f   :  { %v78_v12 = vsel %vm19_vm0, %v76_v11, 0.0 }
  0x90   :  { %79 = vadd.xlane.f32.xlu0 %v78_v12 }
  0x94   :  { %v71_v13 = vld [vmem:[#allocation2 + $0x8] sm:$0xff] }
  0x95   :  { %v77_v14 = vmul.f32 %v147_v7, %v71_v13 }
  0x97   :  { %v81_v15 = vsel %vm19_vm0, %v77_v14, 0.0 }
  0x98   :  { %82 = vadd.xlane.f32.xlu0 %v81_v15 }
 0x103   :  { %v80_v16 = vpop.xlane.xlu0 %79 }
 0x104   :  { %v84_v17 = vmax.f32 %v80_v16, 0.0 }
 0x106   :  { %v142_v18 = vmul.f32 -1.442695, %v84_v17 }
 0x108   :  { %148 = vpow2.f32 %v142_v18 }
 0x10b   :  { %v83_v19 = vpop.xlane.xlu0 %82 }
 0x10c   :  { %v85_v20 = vmax.f32 %v83_v19, 0.0 }
 0x10e   :  { %v149_v21 = vpop.eup %148  ;;  %v143_v22 = vmul.f32 -1.442695, %v85_v20 }
 0x10f   :  { %v92_v23 = vadd.f32 1.0, %v149_v21 }
 0x110   :  { %150 = vpow2.f32 %v143_v22 }
 0x111   :  { %152 = vrcp.f32 %v92_v23  ;;  %v105_v29 = vand.u32 2147483648, %v92_v23  ;;  %v103_v31 = vand.u32 2147483647, %v92_v23  ;;  %vm99_vm3 = vweird.f32 %v92_v23 }
 0x113   :  { %v106_v34 = vor.u32 1.1754944e-38, %v105_v29  ;;  %vm104_vm6 = vcmp.eq.f32.partialorder %v103_v31, 8.507059e+37 }
 0x116   :  { %v151_v24 = vpop.eup %150 }
 0x117   :  { %v153_v25 = vpop.eup %152  ;;  %v93_v26 = vadd.f32 1.0, %v151_v24 }
 0x118   :  { %v95_v27 = vmul.f32 %v153_v25, %v92_v23  ;;  %vm100_vm2 = vweird.f32 %v153_v25 }
 0x119   :  { %154 = vrcp.f32 %v93_v26  ;;  %vm101_vm5 = vmor %vm99_vm3, %vm100_vm2  ;;  %v120_v39 = vand.u32 2147483648, %v93_v26  ;;  %v118_v41 = vand.u32 2147483647, %v93_v26  ;;  %vm114_vm8 = vweird.f32 %v93_v26 }
 0x11a   :  { %v96_v28 = vsub.f32 1.0, %v95_v27 }
 0x11b   :  { %v121_v43 = vor.u32 1.1754944e-38, %v120_v39  ;;  %vm119_vm10 = vcmp.eq.f32.partialorder %v118_v41, 8.507059e+37 }
 0x11c   :  { %v97_v30 = vmul.f32 %v153_v25, %v96_v28 }
 0x11e   :  { %v98_v32 = vadd.f32 %v153_v25, %v97_v30 }
 0x11f   :  { %v155_v33 = vpop.eup %154 }
 0x120   :  { %v102_v35 = vsel %vm101_vm5, %v153_v25, %v98_v32  ;;  %v110_v36 = vmul.f32 %v155_v33, %v93_v26  ;;  %vm115_vm7 = vweird.f32 %v155_v33 }
 0x121   :  { %v107_v37 = vsel %vm104_vm6, %v106_v34, %v102_v35  ;;  %vm116_vm9 = vmor %vm114_vm8, %vm115_vm7 }
 0x122   :  { %125 = vst.msk [vmem:[%s203_s3] sm:$0xff] %vm124_vm4, %v107_v37  ;;  %v111_v38 = vsub.f32 1.0, %v110_v36 }
 0x124   :  { %v112_v40 = vmul.f32 %v155_v33, %v111_v38 }
 0x126   :  { %v113_v42 = vadd.f32 %v155_v33, %v112_v40 }
 0x128   :  { %v117_v44 = vsel %vm116_vm9, %v155_v33, %v113_v42 }
 0x129   :  { %v122_v45 = vsel %vm119_vm10, %v121_v43, %v117_v44 }
 0x12a   :  { %126 = vst.msk [vmem:[%s203_s3 + $0x8] sm:$0xff] %vm124_vm4, %v122_v45 }

</bundles_post_ra>
